<compile_context>
chip_gen: v7x
topology: tpu7x:2x2x1
jax: 0.10.0
libtpu: 0.0.40
codegen_flags: <defaults>
</compile_context>

<pallas_src>
import jax
import jax.numpy as jnp
from jax.experimental import pallas as pl
from jax.experimental.pallas import tpu as pltpu


def _round_up(x, m):
    return ((x + m - 1) // m) * m


def _pad_to(arr, shape):
    pads = [(0, s - d) for d, s in zip(arr.shape, shape)]
    return jnp.pad(arr, pads)


# ---------------------------------------------------------------------------
# Kernel 1: one GCN layer,  out = relu((A @ Xin) @ W + b), tiled over
# grid = (row_tiles, k_tiles); fp32 accumulator for the aggregation.
# ---------------------------------------------------------------------------
def _gcn_layer_kernel(a_ref, x_ref, w_ref, b_ref, out_ref, acc_ref):
    k = pl.program_id(1)

    @pl.when(k == 0)
    def _():
        acc_ref[...] = jnp.zeros_like(acc_ref)

    # Aggregation: acc[i, :] += A[i, k_tile] @ Xin[k_tile, :]   (bf16 -> f32)
    acc_ref[...] += jnp.dot(a_ref[...], x_ref[...],
                            preferred_element_type=jnp.float32)

    @pl.when(k == pl.num_programs(1) - 1)
    def _():
        # Feature transform + bias + ReLU (bias/ReLU in fp32).
        h = jnp.dot(acc_ref[...].astype(jnp.bfloat16), w_ref[...],
                    preferred_element_type=jnp.float32) + b_ref[...]
        out_ref[...] = jnp.maximum(h, 0.0).astype(out_ref.dtype)


def _gcn_layer(a, xin, w, b, tm, tk, vmem_limit):
    n = a.shape[0]
    fpad = xin.shape[1]
    hpad = w.shape[1]
    grid = (n // tm, n // tk)
    flops = 2 * n * n * fpad + 2 * n * fpad * hpad
    bytes_accessed = (a.size * a.dtype.itemsize + xin.size * xin.dtype.itemsize
                      + w.size * w.dtype.itemsize + b.size * b.dtype.itemsize
                      + n * hpad * 2)
    return pl.pallas_call(
        _gcn_layer_kernel,
        out_shape=jax.ShapeDtypeStruct((n, hpad), jnp.bfloat16),
        grid_spec=pltpu.PrefetchScalarGridSpec(
            num_scalar_prefetch=0,
            grid=grid,
            in_specs=[
                pl.BlockSpec((tm, tk), lambda i, k: (i, k)),      # A tile
                pl.BlockSpec((tk, fpad), lambda i, k: (k, 0)),    # Xin tile
                pl.BlockSpec((fpad, hpad), lambda i, k: (0, 0)),  # W (resident)
                pl.BlockSpec((1, hpad), lambda i, k: (0, 0)),     # b (resident)
            ],
            out_specs=pl.BlockSpec((tm, hpad), lambda i, k: (i, 0)),
            scratch_shapes=[pltpu.VMEM((tm, fpad), jnp.float32)],
        ),
        compiler_params=pltpu.CompilerParams(
            dimension_semantics=("parallel", "arbitrary"),
            vmem_limit_bytes=vmem_limit,
        ),
        cost_estimate=pl.CostEstimate(flops=flops, transcendentals=0,
                                      bytes_accessed=bytes_accessed),
    )(a, xin, w, b)


# ---------------------------------------------------------------------------
# Kernel 2: mean-pool (as matmul with pooling matrix) + final Linear.
#   pooled = P @ H   (accumulated over node tiles);  out = pooled @ W3 + b3
# ---------------------------------------------------------------------------
def _pool_linear_kernel(p_ref, h_ref, w_ref, b_ref, out_ref, acc_ref):
    k = pl.program_id(0)

    @pl.when(k == 0)
    def _():
        acc_ref[...] = jnp.zeros_like(acc_ref)

    acc_ref[...] += jnp.dot(p_ref[...], h_ref[...],
                            preferred_element_type=jnp.float32)

    @pl.when(k == pl.num_programs(0) - 1)
    def _():
        out_ref[...] = (jnp.dot(acc_ref[...].astype(jnp.bfloat16), w_ref[...],
                                preferred_element_type=jnp.float32)
                        + b_ref[...])


def _pool_linear(p, h, w, b, tk, vmem_limit):
    bpad, n = p.shape
    hpad = h.shape[1]
    cpad = w.shape[1]
    grid = (n // tk,)
    flops = 2 * bpad * n * hpad + 2 * bpad * hpad * cpad
    bytes_accessed = (p.size * 2 + h.size * 2 + w.size * 2 + b.size * 4
                      + bpad * cpad * 4)
    return pl.pallas_call(
        _pool_linear_kernel,
        out_shape=jax.ShapeDtypeStruct((bpad, cpad), jnp.float32),
        grid_spec=pltpu.PrefetchScalarGridSpec(
            num_scalar_prefetch=0,
            grid=grid,
            in_specs=[
                pl.BlockSpec((bpad, tk), lambda k: (0, k)),       # P tile
                pl.BlockSpec((tk, hpad), lambda k: (k, 0)),       # H tile
                pl.BlockSpec((hpad, cpad), lambda k: (0, 0)),     # W3
                pl.BlockSpec((1, cpad), lambda k: (0, 0)),        # b3
            ],
            out_specs=pl.BlockSpec((bpad, cpad), lambda k: (0, 0)),
            scratch_shapes=[pltpu.VMEM((bpad, hpad), jnp.float32)],
        ),
        compiler_params=pltpu.CompilerParams(
            dimension_semantics=("arbitrary",),
            vmem_limit_bytes=vmem_limit,
        ),
        cost_estimate=pl.CostEstimate(flops=flops, transcendentals=0,
                                      bytes_accessed=bytes_accessed),
    )(p, h, w, b)


# ---------------------------------------------------------------------------
# Wrapper: pad to lane-dense shapes, cast matmul operands to bf16, pick tiles.
# ---------------------------------------------------------------------------
def gcn_classifier_pallas(a_hat, x, w1, b1, w2, b2, pool, w3, b3,
                          *, tm=None, tk=None, vmem_limit=32 * 1024 * 1024):
    n = a_hat.shape[0]
    f_in = x.shape[1]
    hidden = w1.shape[1]
    num_graphs = pool.shape[0]
    num_classes = w3.shape[1]

    n_pad = _round_up(n, 128)
    f_pad = _round_up(f_in, 128)
    h_pad = _round_up(hidden, 128)
    c_pad = _round_up(num_classes, 128)
    b_pad = _round_up(num_graphs, 8)

    # Tile sizes: big where divisibility allows (amortize ~0.35us/step), but
    # sized so (A tile + X tile) double-buffers + fp32 acc stay well under the
    # 32 MiB scoped-VMEM budget that also fits v7x's 64 MiB physical VMEM.
    if tm is None:
        tm = 256 if n_pad % 256 == 0 else 128
    if tk is None:
        tk = 512 if n_pad % 512 == 0 else (256 if n_pad % 256 == 0 else 128)

    bf16 = jnp.bfloat16
    a_p = _pad_to(a_hat, (n_pad, n_pad)).astype(bf16)
    x_p = _pad_to(x, (n_pad, f_pad)).astype(bf16)
    w1_p = _pad_to(w1, (f_pad, h_pad)).astype(bf16)
    b1_p = _pad_to(b1, (1, h_pad)).astype(jnp.float32)
    w2_p = _pad_to(w2, (h_pad, h_pad)).astype(bf16)
    b2_p = _pad_to(b2, (1, h_pad)).astype(jnp.float32)
    p_p = _pad_to(pool, (b_pad, n_pad)).astype(bf16)
    w3_p = _pad_to(w3, (h_pad, c_pad)).astype(bf16)
    b3_p = _pad_to(b3, (1, c_pad)).astype(jnp.float32)

    h1 = _gcn_layer(a_p, x_p, w1_p, b1_p, tm, tk, vmem_limit)   # [n_pad, h_pad] bf16
    h2 = _gcn_layer(a_p, h1, w2_p, b2_p, tm, tk, vmem_limit)    # [n_pad, h_pad] bf16
    out = _pool_linear(p_p, h2, w3_p, b3_p, tk, vmem_limit)     # [b_pad, c_pad] f32
    return out[:num_graphs, :num_classes]


# ---------------------------------------------------------------------------
# Glue: dense normalized adjacency (gcn_norm) and mean-pool matrix.
# ---------------------------------------------------------------------------
def build_gcn_norm_adjacency(edge_index, num_nodes):
    """Dense A_hat = D^{-1/2} (A + I) D^{-1/2}; aggregation A_hat[dst, src]."""
    self_loops = jnp.stack([jnp.arange(num_nodes), jnp.arange(num_nodes)])
    ei = jnp.concatenate([edge_index, self_loops], axis=1)
    row, col = ei[0], ei[1]                        # src, dst
    w = jnp.ones(ei.shape[1], dtype=jnp.float32)
    deg = jnp.zeros(num_nodes, jnp.float32).at[col].add(w)
    dinv = jnp.where(deg > 0, 1.0 / jnp.sqrt(deg), 0.0)
    norm = dinv[row] * w * dinv[col]
    return jnp.zeros((num_nodes, num_nodes), jnp.float32).at[col, row].add(norm)


def build_mean_pool_matrix(batch, num_graphs):
    onehot = (batch[None, :] == jnp.arange(num_graphs)[:, None]).astype(jnp.float32)
    counts = jnp.maximum(onehot.sum(axis=1, keepdims=True), 1.0)
    return onehot / counts                          # [num_graphs, num_nodes]


# ---------------------------------------------------------------------------
# References.
# ---------------------------------------------------------------------------
def reference_forward_f32(a_hat, x, w1, b1, w2, b2, pool, w3, b3):
    h = jnp.maximum(a_hat @ (x @ w1) + b1, 0.0)
    h = jnp.maximum(a_hat @ (h @ w2) + b2, 0.0)
    return pool @ h @ w3 + b3


def reference_forward_bf16(a_hat, x, w1, b1, w2, b2, pool, w3, b3):
    bf = lambda t: t.astype(jnp.bfloat16)
    dot = lambda a, b: jnp.dot(bf(a), bf(b), preferred_element_type=jnp.float32)
    h = jnp.maximum(dot(dot(a_hat, x), w1) + b1, 0.0)
    h = jnp.maximum(dot(dot(a_hat, h), w2) + b2, 0.0)
    return dot(dot(pool, h), w3) + b3


# ---------------------------------------------------------------------------
# Test harness.
# ---------------------------------------------------------------------------
def _make_ring_graphs(num_graphs, nodes_per_graph):
    edges = []
    for g in range(num_graphs):
        base = g * nodes_per_graph
        for i in range(nodes_per_graph):
            s, d = base + i, base + (i + 1) % nodes_per_graph
            edges.append((s, d))
            edges.append((d, s))
    edge_index = jnp.array(edges, dtype=jnp.int32).T               # [2, E]
    batch = jnp.repeat(jnp.arange(num_graphs, dtype=jnp.int32), nodes_per_graph)
    return edge_index, batch


def _make_params(key, in_channels, hidden_channels, num_classes):
    k_w1, k_b1, k_w2, k_b2, k_w3, k_b3 = jax.random.split(key, 6)
    w1 = jax.random.normal(k_w1, (in_channels, hidden_channels), jnp.float32) * 0.2
    b1 = jax.random.normal(k_b1, (1, hidden_channels), jnp.float32) * 0.05
    w2 = jax.random.normal(k_w2, (hidden_channels, hidden_channels), jnp.float32) * 0.2
    b2 = jax.random.normal(k_b2, (1, hidden_channels), jnp.float32) * 0.05
    w3 = jax.random.normal(k_w3, (hidden_channels, num_classes), jnp.float32) * 0.2
    b3 = jax.random.normal(k_b3, (1, num_classes), jnp.float32) * 0.05
    return w1, b1, w2, b2, w3, b3


def _run_case(key, num_graphs, nodes_per_graph, in_channels, hidden, num_classes):
    k_x, k_p = jax.random.split(key)
    num_nodes = num_graphs * nodes_per_graph
    x = jax.random.normal(k_x, (num_nodes, in_channels), dtype=jnp.float32)
    edge_index, batch = _make_ring_graphs(num_graphs, nodes_per_graph)
    w1, b1, w2, b2, w3, b3 = _make_params(k_p, in_channels, hidden, num_classes)

    a_hat = build_gcn_norm_adjacency(edge_index, num_nodes)
    pool = build_mean_pool_matrix(batch, num_graphs)

    out = gcn_classifier_pallas(a_hat, x, w1, b1, w2, b2, pool, w3, b3)
    out = jax.block_until_ready(out)
    assert out.shape == (num_graphs, num_classes)

    ref_bf16 = reference_forward_bf16(a_hat, x, w1, b1, w2, b2, pool, w3, b3)
    ref_f32 = reference_forward_f32(a_hat, x, w1, b1, w2, b2, pool, w3, b3)
    assert jnp.allclose(out, ref_bf16, atol=5e-3, rtol=5e-3), \
        f"mismatch vs bf16 reference: {jnp.max(jnp.abs(out - ref_bf16))}"
    assert jnp.allclose(out, ref_f32, atol=3e-2, rtol=3e-2), \
        f"mismatch vs fp32 reference: {jnp.max(jnp.abs(out - ref_f32))}"


if __name__ == "__main__":
    key = jax.random.PRNGKey(0)
    k1, k2 = jax.random.split(key)

    # Case 1: small shapes consistent with the module
    # (2 graphs x 8 nodes, in=8, hidden=32, classes=4) -> single-tile grid.
    _run_case(k1, num_graphs=2, nodes_per_graph=8,
              in_channels=8, hidden=32, num_classes=4)

    # Case 2: enough nodes to exercise multi-tile accumulation on the
    # (row, k) grid (3 graphs x 100 nodes -> padded to 384 -> 3x3 grid).
    _run_case(k2, num_graphs=3, nodes_per_graph=100,
              in_channels=8, hidden=32, num_classes=4)

    print("KERNEL_OK")
</pallas_src>

<mosaic_0001>
module attributes {stable_mosaic.version = 11 : i64} {
  func.func @_gcn_layer_kernel(%arg0: i32, %arg1: i32, %arg2: memref<128x128xbf16, #tpu.memory_space<vmem>>, %arg3: memref<128x128xbf16, #tpu.memory_space<vmem>>, %arg4: memref<128x128xbf16, #tpu.memory_space<vmem>>, %arg5: memref<1x128xf32, #tpu.memory_space<vmem>>, %arg6: memref<128x128xbf16, #tpu.memory_space<vmem>>, %arg7: memref<128x128xf32, #tpu.memory_space<vmem>>) attributes {dimension_semantics = [#tpu.dimension_semantics<parallel>, #tpu.dimension_semantics<arbitrary>], iteration_bounds = array<i64: 1, 1>, scalar_prefetch = 0 : i64, scratch_operands = 1 : i64, tpu.core_type = #tpu.core_type<tc>, window_params = [{transform_indices = @transform_0, window_bounds = array<i64: 128, 128>}, {transform_indices = @transform_1, window_bounds = array<i64: 128, 128>}, {pipeline_mode = #tpu.pipeline_mode<synchronous>, transform_indices = @transform_2, window_bounds = array<i64: 128, 128>}, {pipeline_mode = #tpu.pipeline_mode<synchronous>, transform_indices = @transform_3, window_bounds = array<i64: 1, 128>}, {transform_indices = @transform_4, window_bounds = array<i64: 128, 128>}]} {
    %c0_i32 = arith.constant 0 : i32
    %0 = arith.cmpi eq, %arg1, %c0_i32 : i32
    %1 = arith.extui %0 : i1 to i32
    %c0_i32_0 = arith.constant 0 : i32
    %2 = arith.cmpi ne, %1, %c0_i32_0 : i32
    scf.if %2 {
      %cst_10 = arith.constant 0.000000e+00 : f32
      %12 = vector.broadcast %cst_10 : f32 to vector<128x128xf32>
      %c0_11 = arith.constant 0 : index
      %c0_12 = arith.constant 0 : index
      %13 = vector.load %arg7[%c0_11, %c0_12] : memref<128x128xf32, #tpu.memory_space<vmem>>, vector<128x128xf32>
      tpu.vector_store %arg7[%c0_11, %c0_12], %12 {strides = array<i32>} : memref<128x128xf32, #tpu.memory_space<vmem>>, vector<128x128xf32>,
    } else {
    }
    %c0 = arith.constant 0 : index
    %c0_1 = arith.constant 0 : index
    %3 = vector.load %arg7[%c0, %c0_1] : memref<128x128xf32, #tpu.memory_space<vmem>>, vector<128x128xf32>
    %c0_2 = arith.constant 0 : index
    %c0_3 = arith.constant 0 : index
    %4 = vector.load %arg2[%c0_2, %c0_3] : memref<128x128xbf16, #tpu.memory_space<vmem>>, vector<128x128xbf16>
    %c0_4 = arith.constant 0 : index
    %c0_5 = arith.constant 0 : index
    %5 = vector.load %arg3[%c0_4, %c0_5] : memref<128x128xbf16, #tpu.memory_space<vmem>>, vector<128x128xbf16>
    %cst = arith.constant dense<0.000000e+00> : vector<128x128xf32>
    %6 = tpu.matmul %4, %5, %cst {dimension_numbers = #tpu.dot_dimension_numbers<[1], [0], [0], [1], [0, 0, 1, 1], [], []>} : vector<128x128xbf16>, vector<128x128xbf16>, vector<128x128xf32> -> vector<128x128xf32>
    %7 = arith.addf %3, %6 : vector<128x128xf32>
    %c0_6 = arith.constant 0 : index
    %c0_7 = arith.constant 0 : index
    %8 = vector.load %arg7[%c0_6, %c0_7] : memref<128x128xf32, #tpu.memory_space<vmem>>, vector<128x128xf32>
    tpu.vector_store %arg7[%c0_6, %c0_7], %7 {strides = array<i32>} : memref<128x128xf32, #tpu.memory_space<vmem>>, vector<128x128xf32>,
    %c0_i32_8 = arith.constant 0 : i32
    %9 = arith.cmpi eq, %arg1, %c0_i32_8 : i32
    %10 = arith.extui %9 : i1 to i32
    %c0_i32_9 = arith.constant 0 : i32
    %11 = arith.cmpi ne, %10, %c0_i32_9 : i32
    scf.if %11 {
      %c0_10 = arith.constant 0 : index
      %c0_11 = arith.constant 0 : index
      %12 = vector.load %arg7[%c0_10, %c0_11] : memref<128x128xf32, #tpu.memory_space<vmem>>, vector<128x128xf32>
      %13 = arith.truncf %12 : vector<128x128xf32> to vector<128x128xbf16>
      %c0_12 = arith.constant 0 : index
      %c0_13 = arith.constant 0 : index
      %14 = vector.load %arg4[%c0_12, %c0_13] : memref<128x128xbf16, #tpu.memory_space<vmem>>, vector<128x128xbf16>
      %cst_14 = arith.constant dense<0.000000e+00> : vector<128x128xf32>
      %15 = tpu.matmul %13, %14, %cst_14 {dimension_numbers = #tpu.dot_dimension_numbers<[1], [0], [0], [1], [0, 0, 1, 1], [], []>} : vector<128x128xbf16>, vector<128x128xbf16>, vector<128x128xf32> -> vector<128x128xf32>
      %c0_15 = arith.constant 0 : index
      %c0_16 = arith.constant 0 : index
      %16 = vector.load %arg5[%c0_15, %c0_16] : memref<1x128xf32, #tpu.memory_space<vmem>>, vector<1x128xf32>
      %17 = vector.broadcast %16 : vector<1x128xf32> to vector<128x128xf32>
      %18 = arith.addf %15, %17 : vector<128x128xf32>
      %cst_17 = arith.constant 0.000000e+00 : f32
      %19 = vector.broadcast %cst_17 : f32 to vector<128x128xf32>
      %20 = arith.maximumf %18, %19 : vector<128x128xf32>
      %21 = arith.truncf %20 : vector<128x128xf32> to vector<128x128xbf16>
      %c0_18 = arith.constant 0 : index
      %c0_19 = arith.constant 0 : index
      %22 = vector.load %arg6[%c0_18, %c0_19] : memref<128x128xbf16, #tpu.memory_space<vmem>>, vector<128x128xbf16>
      tpu.vector_store %arg6[%c0_18, %c0_19], %21 {strides = array<i32>} : memref<128x128xbf16, #tpu.memory_space<vmem>>, vector<128x128xbf16>,
    } else {
    }
    return
  }
  func.func @transform_0(%arg0: i32, %arg1: i32) -> (i32, i32) {
    %c0_i32 = arith.constant 0 : i32
    return %arg0, %arg1 : i32, i32
  }
  func.func @transform_1(%arg0: i32, %arg1: i32) -> (i32, i32) {
    %c0_i32 = arith.constant 0 : i32
    %c0_i32_0 = arith.constant 0 : i32
    return %arg1, %c0_i32 : i32, i32
  }
  func.func @transform_2(%arg0: i32, %arg1: i32) -> (i32, i32) {
    %c0_i32 = arith.constant 0 : i32
    %c0_i32_0 = arith.constant 0 : i32
    %c0_i32_1 = arith.constant 0 : i32
    return %c0_i32, %c0_i32_0 : i32, i32
  }
  func.func @transform_3(%arg0: i32, %arg1: i32) -> (i32, i32) {
    %c0_i32 = arith.constant 0 : i32
    %c0_i32_0 = arith.constant 0 : i32
    %c0_i32_1 = arith.constant 0 : i32
    return %c0_i32, %c0_i32_0 : i32, i32
  }
  func.func @transform_4(%arg0: i32, %arg1: i32) -> (i32, i32) {
    %c0_i32 = arith.constant 0 : i32
    %c0_i32_0 = arith.constant 0 : i32
    return %arg0, %c0_i32 : i32, i32
  }
}

</mosaic_0001>

<bundles_post_ra>
// kernel: tpu_custom_call.1
= control target key start
LH: loop header
LB: loop body
LE: loop exit
PB: predicated region body
PF: predicated region fallthrough
CT: control target
= control target key end

     0   :  { %9 = vsyncpa [#allocation4], 0  ;;  %s1087_s0 = inlined_call_operand.hbm [shape: bf16[128,128], index: 0, kind: input, shape index: {}]   ;;  %s1088_s1 = inlined_call_operand.hbm [shape: bf16[128,128], index: 1, kind: input, shape index: {}]   ;;  %s1089_s2 = inlined_call_operand.hbm [shape: bf16[128,128], index: 2, kind: input, shape index: {}]   ;;  %s1090_s3 = inlined_call_operand.vmem [shape: f32[1,128], index: 3, kind: input, shape index: {}]   ;;  %s1091_s4 = inlined_call_operand.hbm [shape: bf16[128,128], index: 4, kind: output, shape index: {}]  }
   0x1   :  { %10 = vsyncpa [#allocation7], 0 }
   0x2   :  { %11 = vsyncpa [#allocation5], 0  ;;  %s986_s15 = smov [#allocation6]   ;;  %s987_s17 = smov [#allocation3]  }
   0x3   :  { %s29_s16 = sshll.u32 %s986_s15, 4  ;;  %s17_s18 = sshll.u32 %s987_s17, 4  ;;  %s30_s16 = int_to_ptr.vmem [resolvable:$true] %s29_s16  ;;  %s1017_s18 = int_to_ptr.vmem [resolvable:$true] %s17_s18 }
   0x4   :  { %s892_s21 = scalar_lea.hbm %s1088_s1, 1024 }
   0x5   :  { %p893_p0 = scmp.ne.s32.totalorder %s1088_s1, %s892_s21  ;;  %p896_p1 = scmp.lt.u32.totalorder %s892_s21, %s1088_s1 }
   0x7   :  { %p898_p2 = pnand %p896_p1, %p893_p0 }
   0x9   :  { %901 = shalt.err (!%p898_p2)
}
   0xa   :  { %s902_s26 = scalar_lea.vmem %s30_s16, 1024  ;;  %p907_p4 = scmp.lt.s32.totalorder %s30_s16, %s30_s16 }
   0xb   :  { %p903_p3 = scmp.ne.s32.totalorder %s30_s16, %s902_s26  ;;  %p908_p5 = scmp.lt.s32.totalorder %s902_s26, %s902_s26 }
   0xd   :  { %p909_p6 = por %p908_p5, %p907_p4 }
   0xf   :  { %p910_p7 = pnand %p909_p6, %p903_p3 }
  0x11   :  { %913 = shalt.err (!%p910_p7)
}
  0x12   :  { %s988_s27 = smov 64   ;;  %s989_s28 = smov 4  }
  0x13   :  { %35 = dma.hbm_to_vmem [thread:$0]  %s1088_s1, 1024, %s30_s16, [#allocation7], %s988_s27, %s988_s27, %s989_s28  }
  0x14   :  { %s914_s7 = scalar_lea.hbm %s1087_s0, 1024 }
  0x15   :  { %p915_p8 = scmp.ne.s32.totalorder %s1087_s0, %s914_s7  ;;  %p918_p9 = scmp.lt.u32.totalorder %s914_s7, %s1087_s0 }
  0x17   :  { %p920_p10 = pnand %p918_p9, %p915_p8 }
  0x19   :  { %923 = shalt.err (!%p920_p10)
}
  0x1a   :  { %s924_s12 = scalar_lea.vmem %s1017_s18, 1024  ;;  %p929_p12 = scmp.lt.s32.totalorder %s1017_s18, %s1017_s18 }
  0x1b   :  { %p925_p11 = scmp.ne.s32.totalorder %s1017_s18, %s924_s12  ;;  %p930_p13 = scmp.lt.s32.totalorder %s924_s12, %s924_s12 }
  0x1d   :  { %p931_p0 = por %p930_p13, %p929_p12 }
  0x1f   :  { %p932_p1 = pnand %p931_p0, %p925_p11 }
  0x21   :  { %935 = shalt.err (!%p932_p1)
}
  0x22   :  { %23 = dma.hbm_to_vmem [thread:$0]  %s1087_s0, 1024, %s1017_s18, [#allocation4], %s988_s27, %s988_s27, %s989_s28  }
  0x23   :  { %s990_s14 = smov [#allocation8]   ;;  %s936_s19 = scalar_lea.hbm %s1089_s2, 1024 }
  0x24   :  { %s41_s15 = sshll.u32 %s990_s14, 4  ;;  %p937_p2 = scmp.ne.s32.totalorder %s1089_s2, %s936_s19  ;;  %s42_s15 = int_to_ptr.vmem [resolvable:$true] %s41_s15 }
  0x25   :  { %p940_p3 = scmp.lt.u32.totalorder %s936_s19, %s1089_s2 }
  0x27   :  { %p942_p4 = pnand %p940_p3, %p937_p2 }
  0x29   :  { %945 = shalt.err (!%p942_p4)
}
  0x2a   :  { %s946_s24 = scalar_lea.vmem %s42_s15, 1024  ;;  %p951_p6 = scmp.lt.s32.totalorder %s42_s15, %s42_s15 }
  0x2b   :  { %p947_p5 = scmp.ne.s32.totalorder %s42_s15, %s946_s24  ;;  %p952_p7 = scmp.lt.s32.totalorder %s946_s24, %s946_s24 }
  0x2d   :  { %p953_p8 = por %p952_p7, %p951_p6 }
  0x2f   :  { %p954_p9 = pnand %p953_p8, %p947_p5 }
  0x31   :  { %957 = shalt.err (!%p954_p9)
}
  0x32   :  { %47 = dma.hbm_to_vmem [thread:$0]  %s1089_s2, 1024, %s42_s15, [#allocation7], %s988_s27, %s988_s27, %s989_s28  }
  0x33   :  { %980 = dma.done.wait [#allocation4], 1024  }
  0x34   :  { %981 = vsyncadd [#allocation4], 4294966272 }
  0x35   :  { %982 = dma.done.wait [#allocation7], 2048  }
  0x36   :  { %983 = vsyncadd [#allocation7], 4294965248  ;;  %v868_v0 = vld [vmem:[#allocation6] sm:$0xff]   ;;  %v869_v1 = vld [vmem:[#allocation6 + $0x8] sm:$0xff]  }
  0x37   :  { %798 = vmatprep.subr.bf16.mxu0 %v868_v0  ;;  %v870_v2 = vld [vmem:[#allocation6 + $0x10] sm:$0xff]   ;;  %v871_v3 = vld [vmem:[#allocation6 + $0x18] sm:$0xff]   ;;  %v876_v4 = vld [vmem:[#allocation3] sm:$0xff]  }
  0x38   :  { %799 = vmatpush3.bf16.msra.mxu0 %v868_v0  ;;  %814 = vmatprep.mubr.bf16.mxu0 %v876_v4  ;;  %v872_v5 = vld [vmem:[#allocation6 + $0x20] sm:$0xff]   ;;  %v873_v6 = vld [vmem:[#allocation6 + $0x28] sm:$0xff]   ;;  %v874_v9 = vld [vmem:[#allocation6 + $0x30] sm:$0xff]  }
  0x39   :  { %800 = vmatprep.subr.bf16.mxu0 %v869_v1  ;;  %v884_v7 = vld [vmem:[#allocation8] sm:$0xff]   ;;  %v885_v8 = vld [vmem:[#allocation8 + $0x8] sm:$0xff]   ;;  %v886_v10 = vld [vmem:[#allocation8 + $0x10] sm:$0xff]  }
  0x3a   :  { %830 = vmatprep.subr.bf16.mxu1 %v884_v7  ;;  %v875_v11 = vld [vmem:[#allocation6 + $0x38] sm:$0xff]   ;;  %v888_v13 = vld [vmem:[#allocation8 + $0x20] sm:$0xff]   ;;  %v877_v14 = vld [vmem:[#allocation3 + $0x8] sm:$0xff]  }
  0x3b   :  { %831 = vmatpush3.bf16.msra.mxu1 %v884_v7  ;;  %v887_v12 = vld [vmem:[#allocation8 + $0x18] sm:$0xff]   ;;  %v878_v15 = vld [vmem:[#allocation3 + $0x10] sm:$0xff]   ;;  %v889_v16 = vld [vmem:[#allocation8 + $0x28] sm:$0xff]  }
  0x3c   :  { %801 = vmatpush3.bf16.msra.mxu0 %v869_v1  ;;  %832 = vmatprep.subr.bf16.mxu1 %v885_v8  ;;  %v890_v17 = vld [vmem:[#allocation8 + $0x30] sm:$0xff]   ;;  %v879_v18 = vld [vmem:[#allocation3 + $0x18] sm:$0xff]   ;;  %v880_v19 = vld [vmem:[#allocation3 + $0x20] sm:$0xff]  }
  0x3d   :  { %802 = vmatprep.subr.bf16.mxu0 %v870_v2  ;;  %v881_v20 = vld [vmem:[#allocation3 + $0x28] sm:$0xff]   ;;  %v882_v21 = vld [vmem:[#allocation3 + $0x30] sm:$0xff]   ;;  %v883_v22 = vld [vmem:[#allocation3 + $0x38] sm:$0xff]  }
  0x3e   :  { %v891_v23 = vld [vmem:[#allocation8 + $0x38] sm:$0xff]   ;;  %v678_v48 = vld [vmem:[%s1090_s3] ss:$0 sm:$0xff]  ;;  %s991_s3 = smov [#allocation9]  }
  0x3f   :  { %833 = vmatpush3.bf16.msra.mxu1 %v885_v8  ;;  %s649_s26 = sshll.u32 %s991_s3, 4  ;;  %s650_s26 = int_to_ptr.vmem [resolvable:$true] %s649_s26 }
  0x40   :  { %803 = vmatpush3.bf16.msra.mxu0 %v870_v2  ;;  %834 = vmatprep.subr.bf16.mxu1 %v886_v10  ;;  %s958_s29 = scalar_lea.vmem %s650_s26, 1024  ;;  %p963_p11 = scmp.lt.s32.totalorder %s650_s26, %s650_s26 }
  0x41   :  { %804 = vmatprep.subr.bf16.mxu0 %v871_v3  ;;  %p959_p10 = scmp.ne.s32.totalorder %s650_s26, %s958_s29  ;;  %p964_p12 = scmp.lt.s32.totalorder %s958_s29, %s958_s29 }
  0x43   :  { %835 = vmatpush3.bf16.msra.mxu1 %v886_v10  ;;  %p965_p13 = por %p964_p12, %p963_p11 }
  0x44   :  { %805 = vmatpush3.bf16.msra.mxu0 %v871_v3  ;;  %836 = vmatprep.subr.bf16.mxu1 %v887_v12 }
  0x45   :  { %806 = vmatprep.subr.bf16.mxu0 %v872_v5  ;;  %p966_p0 = pnand %p965_p13, %p959_p10 }
  0x47   :  { %837 = vmatpush3.bf16.msra.mxu1 %v887_v12 }
  0x48   :  { %807 = vmatpush3.bf16.msra.mxu0 %v872_v5  ;;  %838 = vmatprep.subr.bf16.mxu1 %v888_v13 }
  0x49   :  { %808 = vmatprep.subr.bf16.mxu0 %v873_v6 }
  0x4b   :  { %839 = vmatpush3.bf16.msra.mxu1 %v888_v13 }
  0x4c   :  { %809 = vmatpush3.bf16.msra.mxu0 %v873_v6  ;;  %840 = vmatprep.subr.bf16.mxu1 %v889_v16 }
  0x4d   :  { %810 = vmatprep.subr.bf16.mxu0 %v874_v9 }
  0x4f   :  { %841 = vmatpush3.bf16.msra.mxu1 %v889_v16 }
  0x50   :  { %811 = vmatpush3.bf16.msra.mxu0 %v874_v9  ;;  %842 = vmatprep.subr.bf16.mxu1 %v890_v17 }
  0x51   :  { %812 = vmatprep.subr.bf16.mxu0 %v875_v11 }
  0x53   :  { %843 = vmatpush3.bf16.msra.mxu1 %v890_v17 }
  0x54   :  { %813 = vmatpush3.bf16.msra.mxu0 %v875_v11  ;;  %844 = vmatprep.subr.bf16.mxu1 %v891_v23 }
  0x57   :  { %815 = vmatmul.mubr.bf16.vlgmr.msra.gmra.mrb[0].mxu0 %v877_v14  ;;  %845 = vmatpush3.bf16.msra.mxu1 %v891_v23 }
  0x58   :  { %818 = vmatprep.mubr.bf16.mxu0 %v878_v15 }
  0x5f   :  { %819 = vmatmul.mubr.bf16.gmra.mrb[4].mxu0 %v879_v18 }
  0x60   :  { %822 = vmatprep.mubr.bf16.mxu0 %v880_v19 }
  0x67   :  { %823 = vmatmul.mubr.bf16.gmra.mrb[8].mxu0 %v881_v20 }
  0x68   :  { %826 = vmatprep.mubr.bf16.mxu0 %v882_v21 }
  0x6f   :  { %827 = vmatmul.mubr.bf16.gmra.mrb[12].mxu0 %v883_v22 }
 0x12a   :  { %v816_v24 = vpop.f32.mrb[0].mxu0 }
 0x12b   :  { %v258_v25 = vpop.f32.mrb[1].mxu0 }
 0x12c   :  { %v817_v26 = vpop.f32.mrb[2].mxu0 }
 0x12d   :  { %v373_v27 = vpack.c.bf16 %v817_v26, %v816_v24  ;;  %v261_v28 = vpop.f32.mrb[3].mxu0 }
 0x12e   :  { %v372_v29 = vpack.c.bf16 %v261_v28, %v258_v25 }
 0x130   :  { %846 = vmatprep.mubr.bf16.mxu1 %v372_v29 }
 0x131   :  { %847 = vmatmul.mubr.bf16.vlgmr.msra.gmra.mrb[0].mxu1 %v373_v27 }
 0x132   :  { %v820_v30 = vpop.f32.mrb[4].mxu0 }
 0x133   :  { %v274_v31 = vpop.f32.mrb[5].mxu0 }
 0x134   :  { %v821_v32 = vpop.f32.mrb[6].mxu0 }
 0x135   :  { %v375_v33 = vpack.c.bf16 %v821_v32, %v820_v30  ;;  %v277_v34 = vpop.f32.mrb[7].mxu0 }
 0x136   :  { %v374_v35 = vpack.c.bf16 %v277_v34, %v274_v31 }
 0x138   :  { %850 = vmatprep.mubr.bf16.mxu1 %v374_v35 }
 0x139   :  { %851 = vmatmul.mubr.bf16.gmra.mrb[4].mxu1 %v375_v33 }
 0x13a   :  { %v824_v36 = vpop.f32.mrb[8].mxu0 }
 0x13b   :  { %v290_v37 = vpop.f32.mrb[9].mxu0 }
 0x13c   :  { %v825_v38 = vpop.f32.mrb[10].mxu0 }
 0x13d   :  { %v377_v39 = vpack.c.bf16 %v825_v38, %v824_v36  ;;  %v293_v40 = vpop.f32.mrb[11].mxu0 }
 0x13e   :  { %v376_v41 = vpack.c.bf16 %v293_v40, %v290_v37 }
 0x140   :  { %854 = vmatprep.mubr.bf16.mxu1 %v376_v41 }
 0x141   :  { %855 = vmatmul.mubr.bf16.gmra.mrb[8].mxu1 %v377_v39 }
 0x142   :  { %v828_v42 = vpop.f32.mrb[12].mxu0 }
 0x143   :  { %v306_v43 = vpop.f32.mrb[13].mxu0 }
 0x144   :  { %v829_v44 = vpop.f32.mrb[14].mxu0 }
 0x145   :  { %v379_v45 = vpack.c.bf16 %v829_v44, %v828_v42  ;;  %v309_v46 = vpop.f32.mrb[15].mxu0 }
 0x146   :  { %v378_v47 = vpack.c.bf16 %v309_v46, %v306_v43 }
 0x148   :  { %858 = vmatprep.mubr.bf16.mxu1 %v378_v47 }
 0x149   :  { %859 = vmatmul.mubr.bf16.gmra.mrb[12].mxu1 %v379_v45 }
 0x204   :  { %v848_v49 = vpop.f32.mrb[0].mxu1 }
 0x205   :  { %v494_v50 = vadd.f32 %v848_v49, %v678_v48  ;;  %v485_v51 = vpop.f32.mrb[1].mxu1 }
 0x206   :  { %v486_v52 = vadd.f32 %v678_v48, %v485_v51  ;;  %v849_v53 = vpop.f32.mrb[2].mxu1 }
 0x207   :  { %v497_v54 = vadd.f32 %v849_v53, %v678_v48  ;;  %v488_v55 = vpop.f32.mrb[3].mxu1  ;;  %v550_v57 = vmax.f32 %v494_v50, 0.0 }
 0x208   :  { %v489_v56 = vadd.f32 %v678_v48, %v488_v55  ;;  %v548_v59 = vmax.f32 %v486_v52, 0.0 }
 0x209   :  { %v551_v58 = vmax.f32 %v497_v54, 0.0 }
 0x20a   :  { %v549_v60 = vmax.f32 %v489_v56, 0.0 }
 0x20b   :  { %v727_v61 = vpack.c.bf16 %v551_v58, %v550_v57 }
 0x20c   :  { %v722_v62 = vpack.c.bf16 %v549_v60, %v548_v59  ;;  %v852_v63 = vpop.f32.mrb[4].mxu1 }
 0x20d   :  { %759 = vst [vmem:[#allocation9 + $0x8] sm:$0xff] %v727_v61   ;;  %v510_v0 = vadd.f32 %v852_v63, %v678_v48  ;;  %v501_v1 = vpop.f32.mrb[5].mxu1 }
 0x20e   :  { %723 = vst [vmem:[#allocation9] sm:$0xff] %v722_v62   ;;  %v502_v2 = vadd.f32 %v678_v48, %v501_v1  ;;  %v853_v3 = vpop.f32.mrb[6].mxu1 }
 0x20f   :  { %v513_v4 = vadd.f32 %v853_v3, %v678_v48  ;;  %v504_v5 = vpop.f32.mrb[7].mxu1  ;;  %v554_v7 = vmax.f32 %v510_v0, 0.0 }
 0x210   :  { %v505_v6 = vadd.f32 %v678_v48, %v504_v5  ;;  %v552_v9 = vmax.f32 %v502_v2, 0.0 }
 0x211   :  { %v555_v8 = vmax.f32 %v513_v4, 0.0 }
 0x212   :  { %v553_v10 = vmax.f32 %v505_v6, 0.0 }
 0x213   :  { %v737_v11 = vpack.c.bf16 %v555_v8, %v554_v7 }
 0x214   :  { %v732_v12 = vpack.c.bf16 %v553_v10, %v552_v9  ;;  %v856_v13 = vpop.f32.mrb[8].mxu1 }
 0x215   :  { %761 = vst [vmem:[#allocation9 + $0x18] sm:$0xff] %v737_v11   ;;  %v526_v14 = vadd.f32 %v856_v13, %v678_v48  ;;  %v517_v15 = vpop.f32.mrb[9].mxu1 }
 0x216   :  { %760 = vst [vmem:[#allocation9 + $0x10] sm:$0xff] %v732_v12   ;;  %v518_v16 = vadd.f32 %v678_v48, %v517_v15  ;;  %v857_v17 = vpop.f32.mrb[10].mxu1 }
 0x217   :  { %v529_v18 = vadd.f32 %v857_v17, %v678_v48  ;;  %v520_v19 = vpop.f32.mrb[11].mxu1  ;;  %v558_v21 = vmax.f32 %v526_v14, 0.0 }
 0x218   :  { %v521_v20 = vadd.f32 %v678_v48, %v520_v19  ;;  %v556_v23 = vmax.f32 %v518_v16, 0.0 }
 0x219   :  { %v559_v22 = vmax.f32 %v529_v18, 0.0 }
 0x21a   :  { %v557_v24 = vmax.f32 %v521_v20, 0.0 }
 0x21b   :  { %v747_v25 = vpack.c.bf16 %v559_v22, %v558_v21 }
 0x21c   :  { %v742_v26 = vpack.c.bf16 %v557_v24, %v556_v23  ;;  %v860_v27 = vpop.f32.mrb[12].mxu1 }
 0x21d   :  { %763 = vst [vmem:[#allocation9 + $0x28] sm:$0xff] %v747_v25   ;;  %v542_v28 = vadd.f32 %v860_v27, %v678_v48  ;;  %v533_v29 = vpop.f32.mrb[13].mxu1 }
 0x21e   :  { %762 = vst [vmem:[#allocation9 + $0x20] sm:$0xff] %v742_v26   ;;  %v534_v30 = vadd.f32 %v678_v48, %v533_v29  ;;  %v861_v31 = vpop.f32.mrb[14].mxu1 }
 0x21f   :  { %v545_v32 = vadd.f32 %v861_v31, %v678_v48  ;;  %v536_v33 = vpop.f32.mrb[15].mxu1  ;;  %v562_v35 = vmax.f32 %v542_v28, 0.0 }
 0x220   :  { %v537_v34 = vadd.f32 %v678_v48, %v536_v33  ;;  %v560_v37 = vmax.f32 %v534_v30, 0.0 }
 0x221   :  { %v563_v36 = vmax.f32 %v545_v32, 0.0 }
 0x222   :  { %v561_v38 = vmax.f32 %v537_v34, 0.0 }
 0x223   :  { %v757_v39 = vpack.c.bf16 %v563_v36, %v562_v35 }
 0x224   :  { %v752_v40 = vpack.c.bf16 %v561_v38, %v560_v37 }
 0x225   :  { %765 = vst [vmem:[#allocation9 + $0x38] sm:$0xff] %v757_v39  }
 0x226   :  { %764 = vst [vmem:[#allocation9 + $0x30] sm:$0xff] %v752_v40  }
 0x227   :  { %969 = shalt.err (!%p966_p0)
}
 0x228   :  { %s970_s6 = scalar_lea.hbm %s1091_s4, 1024 }
 0x229   :  { %p971_p1 = scmp.ne.s32.totalorder %s1091_s4, %s970_s6  ;;  %p974_p2 = scmp.lt.u32.totalorder %s970_s6, %s1091_s4 }
 0x22b   :  { %p976_p3 = pnand %p974_p2, %p971_p1 }
 0x22d   :  { %979 = shalt.err (!%p976_p3)
}
 0x22e   :  { %655 = dma.vmem_to_hbm [thread:$0]  %s650_s26, 1024, %s1091_s4, [#allocation5], %s988_s27, %s988_s27, %s989_s28  }
 0x22f   :  { %984 = dma.done.wait [#allocation5], 1024  }
 0x230   :  { %985 = vsyncadd [#allocation5], 4294966272 }
 0x231   :  { %659 = vsyncpa [#allocation4], 1 }
 0x232   :  { %660 = vsyncpa [#allocation7], 1 }
 0x233   :  { %661 = vsyncpa [#allocation5], 1 }

</bundles_post_ra>
